<compile_context>
chip_gen: v7x
topology: tpu7x:2x2x1
jax: 0.10.0
libtpu: 0.0.40
codegen_flags: <defaults>
</compile_context>

<pallas_src>
import functools

import jax
import jax.numpy as jnp
from jax.experimental import pallas as pl
from jax.experimental.pallas import tpu as pltpu

_LANE = 128
_SUBLANE = 8
# Working-set target per grid step: n_streams tensors, double-buffered.
# 24 MiB -> ~4 MiB per buffer for the 3-stream single-layer kernel, which is
# in the measured 85%+ HBM-roofline regime, with headroom on v7x (64 MiB VMEM).
_VMEM_BUDGET = 24 << 20
_VMEM_LIMIT = 48 << 20  # explicit scoped-VMEM limit, safe on v5e/v6e/v7x


def _activation(name, x):
    if name == "sigmoid":
        return jax.nn.sigmoid(x)
    if name == "tanh":
        return jnp.tanh(x)
    if name == "relu":
        return jnp.maximum(x, 0.0)
    raise ValueError(f"unknown activation {name!r}")


def _round_up(x, m):
    return ((x + m - 1) // m) * m


def _pick_tiles(B, d, itemsize, n_streams):
    """Choose (batch_tile, feature_tile) under the VMEM budget.

    n_streams = number of (TB, DF)-sized tensors that get double-buffered
    (3 for the single-layer kernel: base/src/out; 4 for the fused stack).
    """
    per_elem = 2 * n_streams * itemsize  # double-buffered streams, bytes/elem
    # Feature tile: full d when even an 8-row tile fits the budget, otherwise
    # a 128-lane multiple (ragged last feature block is masked by Pallas).
    max_df_8rows = max(_LANE, _VMEM_BUDGET // (per_elem * _SUBLANE))
    if d <= max_df_8rows:
        df = d
    else:
        df = (max_df_8rows // _LANE) * _LANE
    # Batch tile from the remaining budget.
    tb = _VMEM_BUDGET // (per_elem * df)
    if tb >= B:
        # Whole batch fits in one tile: split anyway (when possible) so a
        # 2-TC chip (v7x) has >= 2 "parallel" grid steps to shard across.
        if B > _SUBLANE:
            tb = _round_up(pl.cdiv(B, 2), _SUBLANE)
            if tb >= B:
                tb = B
        else:
            tb = B
    else:
        tb = max(_SUBLANE, (tb // _SUBLANE) * _SUBLANE)
    return tb, df


def _normalize_h(h, B):
    """Return (h_array, scalar_h).  Scalars go to SMEM, per-sample to VMEM."""
    h_arr = jnp.asarray(h, jnp.float32)
    if h_arr.size == 1:
        return h_arr.reshape(1, 1), True
    return jnp.broadcast_to(h_arr.reshape(-1, 1), (B, 1)), False


# --------------------------------------------------------------------------
# Single-layer kernel:  out = base + act(src) * a * h
# --------------------------------------------------------------------------
def _act_kernel(base_ref, src_ref, h_ref, a_ref, out_ref, *, activation, scalar_h):
    h = h_ref[0, 0] if scalar_h else h_ref[...]          # scalar or (TB, 1) f32
    base = base_ref[...].astype(jnp.float32)             # (TB, DF)
    src = src_ref[...].astype(jnp.float32)               # (TB, DF)
    out = base + _activation(activation, src) * a_ref[...] * h
    out_ref[...] = out.astype(out_ref.dtype)


def activation_module_forward(p, q, h, a, *, activation="sigmoid", mode="up"):
    """Pallas TPU implementation of ActivationModule.forward((p, q, h))."""
    p = jnp.asarray(p)
    q = jnp.asarray(q)
    B, d = p.shape
    assert q.shape == (B, d)
    out_dtype = p.dtype

    if mode == "up":
        base, src = p, q          # compute p_out; q passes through
    elif mode == "low":
        base, src = q, p          # compute q_out; p passes through
    else:
        raise ValueError(f"unknown mode {mode!r}")

    # 'a' and 'h' are tiny -> keep them (and in-kernel compute) in f32 even
    # when p/q are stored in bf16 (bf16 I/O halves HBM traffic on v6e/v7x).
    a2 = jnp.asarray(a, jnp.float32).reshape(1, d)
    h2, scalar_h = _normalize_h(h, B)

    tb, df = _pick_tiles(B, d, jnp.dtype(out_dtype).itemsize, n_streams=3)
    grid = (pl.cdiv(B, tb), pl.cdiv(d, df))

    vmem = pltpu.MemorySpace.VMEM
    smem = pltpu.MemorySpace.SMEM
    h_spec = (pl.BlockSpec((1, 1), lambda i, j: (0, 0), memory_space=smem)
              if scalar_h else
              pl.BlockSpec((tb, 1), lambda i, j: (i, 0), memory_space=vmem))

    kernel = functools.partial(_act_kernel, activation=activation,
                               scalar_h=scalar_h)

    out = pl.pallas_call(
        kernel,
        out_shape=jax.ShapeDtypeStruct((B, d), out_dtype),
        grid=grid,
        in_specs=[
            pl.BlockSpec((tb, df), lambda i, j: (i, j), memory_space=vmem),  # base
            pl.BlockSpec((tb, df), lambda i, j: (i, j), memory_space=vmem),  # src
            h_spec,                                                          # h
            pl.BlockSpec((1, df), lambda i, j: (0, j), memory_space=vmem),   # a
        ],
        out_specs=pl.BlockSpec((tb, df), lambda i, j: (i, j), memory_space=vmem),
        compiler_params=pltpu.CompilerParams(
            dimension_semantics=("parallel", "parallel"),
            vmem_limit_bytes=_VMEM_LIMIT,
        ),
    )(base, src, h2, a2)

    if mode == "up":
        return out, q
    return p, out


# --------------------------------------------------------------------------
# Fused multi-layer stack: p/q stay VMEM-resident across L sympnet layers.
# --------------------------------------------------------------------------
def _stack_kernel(p_ref, q_ref, h_ref, a_ref, p_out_ref, q_out_ref, *,
                  activations, modes, scalar_h):
    h = h_ref[0, 0] if scalar_h else h_ref[...]
    p = p_ref[...].astype(jnp.float32)
    q = q_ref[...].astype(jnp.float32)
    a_all = a_ref[...]                                    # (L, DF) f32, resident
    for layer, (act, mode) in enumerate(zip(activations, modes)):
        a_l = a_all[layer:layer + 1, :]                   # (1, DF), static slice
        if mode == "up":
            p = p + _activation(act, q) * a_l * h
        else:
            q = q + _activation(act, p) * a_l * h
    p_out_ref[...] = p.astype(p_out_ref.dtype)
    q_out_ref[...] = q.astype(q_out_ref.dtype)


def sympnet_activation_stack_forward(p, q, h, a_stack, *, activations, modes):
    """Fused forward of L stacked ActivationModule layers in one pallas_call.

    Equivalent to sequentially applying ActivationModule(mode=modes[l],
    activation=activations[l]) with parameter a_stack[l], but with exactly one
    HBM read + one HBM write of p and q regardless of depth.
    """
    p = jnp.asarray(p)
    q = jnp.asarray(q)
    B, d = p.shape
    assert q.shape == (B, d)
    L = len(modes)
    assert len(activations) == L
    a_stack = jnp.asarray(a_stack, jnp.float32).reshape(L, d)
    out_dtype = p.dtype

    h2, scalar_h = _normalize_h(h, B)
    tb, df = _pick_tiles(B, d, jnp.dtype(out_dtype).itemsize, n_streams=4)
    grid = (pl.cdiv(B, tb), pl.cdiv(d, df))

    vmem = pltpu.MemorySpace.VMEM
    smem = pltpu.MemorySpace.SMEM
    h_spec = (pl.BlockSpec((1, 1), lambda i, j: (0, 0), memory_space=smem)
              if scalar_h else
              pl.BlockSpec((tb, 1), lambda i, j: (i, 0), memory_space=vmem))

    kernel = functools.partial(_stack_kernel, activations=tuple(activations),
                               modes=tuple(modes), scalar_h=scalar_h)

    p_out, q_out = pl.pallas_call(
        kernel,
        out_shape=(jax.ShapeDtypeStruct((B, d), out_dtype),
                   jax.ShapeDtypeStruct((B, d), out_dtype)),
        grid=grid,
        in_specs=[
            pl.BlockSpec((tb, df), lambda i, j: (i, j), memory_space=vmem),  # p
            pl.BlockSpec((tb, df), lambda i, j: (i, j), memory_space=vmem),  # q
            h_spec,                                                          # h
            pl.BlockSpec((L, df), lambda i, j: (0, j), memory_space=vmem),   # a stack
        ],
        out_specs=(
            pl.BlockSpec((tb, df), lambda i, j: (i, j), memory_space=vmem),
            pl.BlockSpec((tb, df), lambda i, j: (i, j), memory_space=vmem),
        ),
        compiler_params=pltpu.CompilerParams(
            dimension_semantics=("parallel", "parallel"),
            vmem_limit_bytes=_VMEM_LIMIT,
        ),
    )(p, q, h2, a_stack)
    return p_out, q_out


# --------------------------------------------------------------------------
# Pure-JAX reference + tests
# --------------------------------------------------------------------------
def _reference_single(p, q, h, a, *, activation, mode):
    a2 = jnp.asarray(a, jnp.float32).reshape(1, -1)
    h2 = jnp.asarray(h, jnp.float32)
    if h2.size != 1:
        h2 = h2.reshape(-1, 1)
    pf = p.astype(jnp.float32)
    qf = q.astype(jnp.float32)
    if mode == "up":
        return (pf + _activation(activation, qf) * a2 * h2).astype(p.dtype), q
    return p, (_activation(activation, pf) * a2 * h2 + qf).astype(q.dtype)


if __name__ == "__main__":
    key = jax.random.PRNGKey(0)
    ok = True

    # Single-layer cases: lane-dense (8,128); non-128 feature dim + ragged
    # batch blocks (12,96); forced 2-step batch grid (48,160).
    for B, d in [(8, 128), (12, 96), (48, 160)]:
        key, kp, kq, kh, ka = jax.random.split(key, 5)
        p = jax.random.normal(kp, (B, d), dtype=jnp.float32)
        q = jax.random.normal(kq, (B, d), dtype=jnp.float32)
        h_scalar = jnp.float32(0.05)
        h_vec = jax.random.uniform(kh, (B, 1), dtype=jnp.float32) * 0.1
        a = jax.random.normal(ka, (d,), dtype=jnp.float32) * 0.01  # randn*0.01 init

        for mode in ("up", "low"):
            for act in ("sigmoid", "tanh", "relu"):
                for h in (h_scalar, h_vec):
                    out = activation_module_forward(p, q, h, a,
                                                    activation=act, mode=mode)
                    out = jax.block_until_ready(out)
                    ref = _reference_single(p, q, h, a, activation=act, mode=mode)
                    for o, r in zip(out, ref):
                        if not jnp.allclose(o, r, atol=1e-6, rtol=1e-6):
                            ok = False
                            print(f"single-layer mismatch: B={B} d={d} "
                                  f"mode={mode} act={act} "
                                  f"scalar_h={jnp.asarray(h).size == 1}")

    # Fused multi-layer stack vs. sequential single-layer reference.
    B, d, L = 12, 96, 4
    key, kp, kq, ka = jax.random.split(key, 4)
    p = jax.random.normal(kp, (B, d), dtype=jnp.float32)
    q = jax.random.normal(kq, (B, d), dtype=jnp.float32)
    a_stack = jax.random.normal(ka, (L, d), dtype=jnp.float32) * 0.01
    modes = ("up", "low", "up", "low")
    acts = ("sigmoid", "tanh", "sigmoid", "relu")
    h = jnp.float32(0.1)

    fused = sympnet_activation_stack_forward(p, q, h, a_stack,
                                             activations=acts, modes=modes)
    fused = jax.block_until_ready(fused)
    rp, rq = p, q
    for layer in range(L):
        rp, rq = _reference_single(rp, rq, h, a_stack[layer],
                                   activation=acts[layer], mode=modes[layer])
    if not (jnp.allclose(fused[0], rp, atol=1e-6, rtol=1e-6)
            and jnp.allclose(fused[1], rq, atol=1e-6, rtol=1e-6)):
        ok = False
        print("fused stack mismatch")

    if ok:
        print("KERNEL_OK")
</pallas_src>

<mosaic_0001>
module attributes {stable_mosaic.version = 11 : i64} {
  func.func @_act_kernel(%arg0: i32, %arg1: i32, %arg2: memref<8x128xf32, #tpu.memory_space<vmem>>, %arg3: memref<8x128xf32, #tpu.memory_space<vmem>>, %arg4: memref<1x1xf32, #tpu.memory_space<smem>>, %arg5: memref<1x128xf32, #tpu.memory_space<vmem>>, %arg6: memref<8x128xf32, #tpu.memory_space<vmem>>) attributes {dimension_semantics = [#tpu.dimension_semantics<parallel>, #tpu.dimension_semantics<parallel>], iteration_bounds = array<i64: 1, 1>, scalar_prefetch = 0 : i64, scratch_operands = 0 : i64, tpu.core_type = #tpu.core_type<tc>, window_params = [{transform_indices = @transform_0, window_bounds = array<i64: 8, 128>}, {transform_indices = @transform_1, window_bounds = array<i64: 8, 128>}, {transform_indices = @transform_2, window_bounds = array<i64: 1, 1>}, {transform_indices = @transform_3, window_bounds = array<i64: 1, 128>}, {transform_indices = @transform_4, window_bounds = array<i64: 8, 128>}]} {
    %c0 = arith.constant 0 : index
    %c0_0 = arith.constant 0 : index
    %0 = memref.load %arg4[%c0, %c0_0] : memref<1x1xf32, #tpu.memory_space<smem>>
    %c0_1 = arith.constant 0 : index
    %c0_2 = arith.constant 0 : index
    %1 = vector.load %arg2[%c0_1, %c0_2] : memref<8x128xf32, #tpu.memory_space<vmem>>, vector<8x128xf32>
    %c0_3 = arith.constant 0 : index
    %c0_4 = arith.constant 0 : index
    %2 = vector.load %arg3[%c0_3, %c0_4] : memref<8x128xf32, #tpu.memory_space<vmem>>, vector<8x128xf32>
    %3 = arith.negf %2 : vector<8x128xf32>
    %4 = math.exp %3 : vector<8x128xf32>
    %cst = arith.constant 1.000000e+00 : f32
    %5 = vector.broadcast %cst : f32 to vector<8x128xf32>
    %6 = arith.addf %5, %4 : vector<8x128xf32>
    %7 = arith.divf %5, %6 : vector<8x128xf32>
    %c0_5 = arith.constant 0 : index
    %c0_6 = arith.constant 0 : index
    %8 = vector.load %arg5[%c0_5, %c0_6] : memref<1x128xf32, #tpu.memory_space<vmem>>, vector<1x128xf32>
    %9 = vector.broadcast %8 : vector<1x128xf32> to vector<8x128xf32>
    %10 = arith.mulf %7, %9 : vector<8x128xf32>
    %11 = vector.broadcast %0 : f32 to vector<8x128xf32>
    %12 = arith.mulf %10, %11 : vector<8x128xf32>
    %13 = arith.addf %1, %12 : vector<8x128xf32>
    %c0_7 = arith.constant 0 : index
    %c0_8 = arith.constant 0 : index
    %14 = vector.load %arg6[%c0_7, %c0_8] : memref<8x128xf32, #tpu.memory_space<vmem>>, vector<8x128xf32>
    tpu.vector_store %arg6[%c0_7, %c0_8], %13 {strides = array<i32>} : memref<8x128xf32, #tpu.memory_space<vmem>>, vector<8x128xf32>,
    return
  }
  func.func @transform_0(%arg0: i32, %arg1: i32) -> (i32, i32) {
    %c0_i32 = arith.constant 0 : i32
    return %arg0, %arg1 : i32, i32
  }
  func.func @transform_1(%arg0: i32, %arg1: i32) -> (i32, i32) {
    %c0_i32 = arith.constant 0 : i32
    return %arg0, %arg1 : i32, i32
  }
  func.func @transform_2(%arg0: i32, %arg1: i32) -> (i32, i32) {
    %c0_i32 = arith.constant 0 : i32
    %c0_i32_0 = arith.constant 0 : i32
    %c0_i32_1 = arith.constant 0 : i32
    return %c0_i32, %c0_i32_0 : i32, i32
  }
  func.func @transform_3(%arg0: i32, %arg1: i32) -> (i32, i32) {
    %c0_i32 = arith.constant 0 : i32
    %c0_i32_0 = arith.constant 0 : i32
    return %c0_i32, %arg1 : i32, i32
  }
  func.func @transform_4(%arg0: i32, %arg1: i32) -> (i32, i32) {
    %c0_i32 = arith.constant 0 : i32
    return %arg0, %arg1 : i32, i32
  }
}

</mosaic_0001>

<bundles_post_ra>
// kernel: tpu_custom_call.1
= control target key start
LH: loop header
LB: loop body
LE: loop exit
PB: predicated region body
PF: predicated region fallthrough
CT: control target
= control target key end

     0   :  { %10 = vsyncpa [#allocation4], 0  ;;  %s231_s0 = inlined_call_operand.hbm [shape: f32[8,128], index: 0, kind: input, shape index: {}]   ;;  %s232_s1 = inlined_call_operand.hbm [shape: f32[8,128], index: 1, kind: input, shape index: {}]   ;;  %s233_s2 = inlined_call_operand.<no memory space> [shape: f32[1,1], index: 2, kind: input, shape index: {}]   ;;  %s234_s3 = inlined_call_operand.vmem [shape: f32[1,128], index: 3, kind: input, shape index: {}]   ;;  %s235_s4 = inlined_call_operand.hbm [shape: f32[8,128], index: 4, kind: output, shape index: {}]  }
   0x1   :  { %11 = vsyncpa [#allocation7], 0 }
   0x2   :  { %12 = vsyncpa [#allocation5], 0  ;;  %s161_s15 = smov [#allocation3]   ;;  %s162_s17 = smov [#allocation6]  }
   0x3   :  { %s19_s16 = sshll.u32 %s161_s15, 4  ;;  %s29_s18 = sshll.u32 %s162_s17, 4  ;;  %s20_s16 = int_to_ptr.vmem [resolvable:$true] %s19_s16  ;;  %s30_s18 = int_to_ptr.vmem [resolvable:$true] %s29_s18 }
   0x4   :  { %s89_s21 = scalar_lea.hbm %s231_s0, 128 }
   0x5   :  { %p90_p0 = scmp.ne.s32.totalorder %s231_s0, %s89_s21  ;;  %p93_p1 = scmp.lt.u32.totalorder %s89_s21, %s231_s0 }
   0x7   :  { %p95_p2 = pnand %p93_p1, %p90_p0 }
   0x9   :  { %98 = shalt.err (!%p95_p2)
}
   0xa   :  { %s99_s26 = scalar_lea.vmem %s20_s16, 128  ;;  %p104_p4 = scmp.lt.s32.totalorder %s20_s16, %s20_s16 }
   0xb   :  { %p100_p3 = scmp.ne.s32.totalorder %s20_s16, %s99_s26  ;;  %p105_p5 = scmp.lt.s32.totalorder %s99_s26, %s99_s26 }
   0xd   :  { %p106_p6 = por %p105_p5, %p104_p4 }
   0xf   :  { %p107_p7 = pnand %p106_p6, %p100_p3 }
  0x11   :  { %110 = shalt.err (!%p107_p7)
}
  0x12   :  { %22 = dma.hbm_to_vmem [thread:$0]  %s231_s0, 128, %s20_s16, [#allocation4]  }
  0x13   :  { %s111_s5 = scalar_lea.hbm %s232_s1, 128 }
  0x14   :  { %p112_p8 = scmp.ne.s32.totalorder %s232_s1, %s111_s5  ;;  %p115_p9 = scmp.lt.u32.totalorder %s111_s5, %s232_s1 }
  0x16   :  { %p117_p10 = pnand %p115_p9, %p112_p8 }
  0x18   :  { %120 = shalt.err (!%p117_p10)
}
  0x19   :  { %s121_s10 = scalar_lea.vmem %s30_s18, 128  ;;  %p126_p12 = scmp.lt.s32.totalorder %s30_s18, %s30_s18 }
  0x1a   :  { %p122_p11 = scmp.ne.s32.totalorder %s30_s18, %s121_s10  ;;  %p127_p13 = scmp.lt.s32.totalorder %s121_s10, %s121_s10 }
  0x1c   :  { %p128_p0 = por %p127_p13, %p126_p12 }
  0x1e   :  { %p129_p1 = pnand %p128_p0, %p122_p11 }
  0x20   :  { %132 = shalt.err (!%p129_p1)
}
  0x21   :  { %32 = dma.hbm_to_vmem [thread:$0]  %s232_s1, 128, %s30_s18, [#allocation7]  }
  0x22   :  { %155 = dma.done.wait [#allocation4], 128  }
  0x23   :  { %156 = vsyncadd [#allocation4], 4294967168 }
  0x24   :  { %157 = dma.done.wait [#allocation7], 128  }
  0x25   :  { %158 = vsyncadd [#allocation7], 4294967168  ;;  %v45_v0 = vld [vmem:[#allocation6] sm:$0xff]  ;;  %v81_v4 = vld [vmem:[%s234_s3] ss:$0 sm:$0xff]  ;;  %v60_v6 = vstv %s233_s2  ;;  %s163_s1 = smov [#allocation8]  }
  0x26   :  { %v80_v1 = vmul.f32 -1.442695, %v45_v0  ;;  %v44_v8 = vld [vmem:[#allocation3] sm:$0xff]  ;;  %s70_s16 = sshll.u32 %s163_s1, 4  ;;  %s71_s16 = int_to_ptr.vmem [resolvable:$true] %s70_s16 }
  0x27   :  { %s133_s17 = scalar_lea.vmem %s71_s16, 128  ;;  %p138_p3 = scmp.lt.s32.totalorder %s71_s16, %s71_s16 }
  0x28   :  { %85 = vpow2.f32 %v80_v1  ;;  %p134_p2 = scmp.ne.s32.totalorder %s71_s16, %s133_s17  ;;  %p139_p4 = scmp.lt.s32.totalorder %s133_s17, %s133_s17 }
  0x2a   :  { %p140_p5 = por %p139_p4, %p138_p3 }
  0x2c   :  { %p141_p6 = pnand %p140_p5, %p134_p2 }
  0x32   :  { %v86_v2 = vpop.eup %85 }
  0x33   :  { %v49_v3 = vadd.f32 1.0, %v86_v2 }
  0x35   :  { %87 = vrcp.f32 %v49_v3 }
  0x3f   :  { %v88_v5 = vpop.eup %87 }
  0x40   :  { %v59_v7 = vmul.f32 %v88_v5, %v81_v4 }
  0x42   :  { %v61_v9 = vmul.f32 %v60_v6, %v59_v7 }
  0x44   :  { %v62_v10 = vadd.f32 %v61_v9, %v44_v8 }
  0x46   :  { %63 = vst [vmem:[#allocation8] sm:$0xff] %v62_v10 }
  0x47   :  { %144 = shalt.err (!%p141_p6)
}
  0x48   :  { %s145_s19 = scalar_lea.hbm %s235_s4, 128 }
  0x49   :  { %p146_p7 = scmp.ne.s32.totalorder %s235_s4, %s145_s19  ;;  %p149_p8 = scmp.lt.u32.totalorder %s145_s19, %s235_s4 }
  0x4b   :  { %p151_p9 = pnand %p149_p8, %p146_p7 }
  0x4d   :  { %154 = shalt.err (!%p151_p9)
}
  0x4e   :  { %73 = dma.vmem_to_hbm [thread:$0]  %s71_s16, 128, %s235_s4, [#allocation5]  }
  0x4f   :  { %159 = dma.done.wait [#allocation5], 128  }
  0x50   :  { %160 = vsyncadd [#allocation5], 4294967168 }
  0x51   :  { %77 = vsyncpa [#allocation4], 1 }
  0x52   :  { %78 = vsyncpa [#allocation7], 1 }
  0x53   :  { %79 = vsyncpa [#allocation5], 1 }

</bundles_post_ra>
